<compile_context>
chip_gen: v7x
topology: tpu7x:2x2x1
jax: 0.10.0
libtpu: 0.0.40
codegen_flags: <defaults>
</compile_context>

<pallas_src>
import functools

import jax
import jax.numpy as jnp
from jax import lax
from jax.experimental import pallas as pl
from jax.experimental.pallas import tpu as pltpu

_EPS = 1e-5
_MAX_GROUPS_PER_BLOCK = 64      # bounds in-kernel unroll over the leading block axis
_FASTPATH_BYTES = 1 << 20       # single fused call when x fits comfortably in VMEM


def _vmem_capacity_bytes():
    try:
        return int(pltpu.get_tpu_info().vmem_capacity_bytes)
    except Exception:
        return 64 << 20         # conservative fallback: v7x per-TensorCore VMEM


def _default_block_budget(vmem_cap):
    # Pass 2 double-buffers input + output (~4x block); keep that under ~3/4 of
    # physical VMEM and never above 12 MiB per block.
    return max(1 << 20, min(12 << 20, (vmem_cap * 3) // 16))


# ---------------------------- kernels ----------------------------------------


def _bn_fused_kernel(x_ref, gamma_ref, beta_ref, o_ref, *, inv_count, eps):
    # Fast path: whole array resident. x_ref (N, C, HW), gamma/beta (1, C, 1).
    x = x_ref[...].astype(jnp.float32)
    s = jnp.sum(x, axis=(0, 2), keepdims=True)          # (1, C, 1)
    ss = jnp.sum(x * x, axis=(0, 2), keepdims=True)     # (1, C, 1)
    mean = s * inv_count
    var = jnp.maximum(ss * inv_count - mean * mean, 0.0)
    scale = gamma_ref[...] * lax.rsqrt(var + eps)        # EUP rsqrt, one shot
    shift = beta_ref[...] - mean * scale
    o_ref[...] = (x * scale + shift).astype(o_ref.dtype)


def _bn_stats_kernel(x_ref, sum_ref, sq_ref):
    # x_ref: (Gb, 8, CHW) lane-dense block; sum/sq: (1, 8, CHW) resident partials
    # (one pair per TensorCore). Pure VALU accumulation — no cross-lane work here;
    # the lane reduction to per-channel scalars happens once, in the wrapper.
    @pl.when(pl.program_id(1) == 0)
    def _init():
        sum_ref[...] = jnp.zeros_like(sum_ref)
        sq_ref[...] = jnp.zeros_like(sq_ref)

    x = x_ref[...].astype(jnp.float32)
    sum_ref[...] += jnp.sum(x, axis=0, keepdims=True)
    sq_ref[...] += jnp.sum(x * x, axis=0, keepdims=True)


def _bn_norm_kernel(scale_ref, shift_ref, x_ref, o_ref):
    # scale/shift: (1, 1, CHW); x/o: (Gb, 8, CHW). Single streaming FMA.
    o_ref[...] = (x_ref[...] * scale_ref[...] + shift_ref[...]).astype(o_ref.dtype)


# ---------------------------- wrapper -----------------------------------------


@functools.partial(jax.jit, static_argnames=("block_budget_bytes", "use_fast_path"))
def td_batchnorm(x_seq, gamma, beta, *, block_budget_bytes=None, use_fast_path=None):
    """SeqToANNContainer(BatchNorm2d(C)) forward (training-mode statistics).

    x_seq: [T, B, C, H, W];  gamma/beta: [C]  -> returns [T, B, C, H, W]
    """
    T, B, C, H, W = x_seq.shape
    N = T * B
    HW = H * W
    CHW = C * HW
    itemsize = x_seq.dtype.itemsize
    inv_count = 1.0 / float(N * HW)

    vmem_cap = _vmem_capacity_bytes()
    if block_budget_bytes is None:
        block_budget_bytes = _default_block_budget(vmem_cap)
    if use_fast_path is None:
        use_fast_path = (N * CHW * itemsize) <= _FASTPATH_BYTES
    vmem_limit = (vmem_cap * 7) // 8

    gamma = gamma.astype(jnp.float32)
    beta = beta.astype(jnp.float32)

    if use_fast_path:
        # One launch, one HBM read of x: stats + normalize from the same block.
        x3 = x_seq.reshape(N, C, HW)
        y3 = pl.pallas_call(
            functools.partial(_bn_fused_kernel, inv_count=inv_count, eps=_EPS),
            out_shape=jax.ShapeDtypeStruct((N, C, HW), x_seq.dtype),
            in_specs=[pl.BlockSpec(memory_space=pltpu.MemorySpace.VMEM)] * 3,
            out_specs=pl.BlockSpec(memory_space=pltpu.MemorySpace.VMEM),
            compiler_params=pltpu.CompilerParams(vmem_limit_bytes=vmem_limit),
        )(x3, gamma.reshape(1, C, 1), beta.reshape(1, C, 1))
        return y3.reshape(T, B, C, H, W)

    # ------------------------- general two-pass path --------------------------
    per_group_bytes = 8 * CHW * itemsize               # one (8, CHW) sublane group
    g_needed = -(-N // 8)
    gb = max(1, min(_MAX_GROUPS_PER_BLOCK, g_needed,
                    block_budget_bytes // per_group_bytes))
    n_blocks = -(-g_needed // gb)
    g_pad = n_blocks * gb
    n_pad = g_pad * 8

    x2 = x_seq.reshape(N, CHW)                          # free reshape, lane = CHW
    if n_pad != N:
        # Zero padding is exact for sum / sum-of-squares; padded rows sliced off.
        x2 = jnp.pad(x2, ((0, n_pad - N), (0, 0)))
    x3 = x2.reshape(g_pad, 8, CHW)                      # free reshape

    # Pass 1: per-core resident (1, 8, CHW) partials; split across 2 TCs if possible.
    n_split = 2 if (n_blocks % 2 == 0 and n_blocks >= 2) else 1
    steps = n_blocks // n_split
    part_sum, part_sq = pl.pallas_call(
        _bn_stats_kernel,
        out_shape=(jax.ShapeDtypeStruct((n_split, 8, CHW), jnp.float32),
                   jax.ShapeDtypeStruct((n_split, 8, CHW), jnp.float32)),
        grid_spec=pltpu.PrefetchScalarGridSpec(
            num_scalar_prefetch=0,
            grid=(n_split, steps),
            in_specs=[pl.BlockSpec((gb, 8, CHW),
                                   lambda p, i: (p * steps + i, 0, 0))],
            out_specs=[pl.BlockSpec((1, 8, CHW), lambda p, i: (p, 0, 0)),
                       pl.BlockSpec((1, 8, CHW), lambda p, i: (p, 0, 0))],
        ),
        compiler_params=pltpu.CompilerParams(
            dimension_semantics=("parallel", "arbitrary"),
            vmem_limit_bytes=vmem_limit),
    )(x3)

    # Tiny one-shot reduction + fold of mean/var/gamma/beta into scale/shift.
    sums = part_sum.reshape(n_split * 8, C, HW).sum(axis=(0, 2))      # (C,)
    sumsq = part_sq.reshape(n_split * 8, C, HW).sum(axis=(0, 2))      # (C,)
    mean = sums * inv_count
    var = jnp.maximum(sumsq * inv_count - mean * mean, 0.0)
    scale = gamma * lax.rsqrt(var + _EPS)                              # (C,)
    shift = beta - mean * scale                                        # (C,)
    scale_row = jnp.repeat(scale, HW).reshape(1, 1, CHW)
    shift_row = jnp.repeat(shift, HW).reshape(1, 1, CHW)

    # Pass 2: pure streaming FMA, parallel over sample blocks, lane-dense output.
    y3 = pl.pallas_call(
        _bn_norm_kernel,
        out_shape=jax.ShapeDtypeStruct((g_pad, 8, CHW), x_seq.dtype),
        grid_spec=pltpu.PrefetchScalarGridSpec(
            num_scalar_prefetch=0,
            grid=(n_blocks,),
            in_specs=[pl.BlockSpec((1, 1, CHW), lambda i: (0, 0, 0)),
                      pl.BlockSpec((1, 1, CHW), lambda i: (0, 0, 0)),
                      pl.BlockSpec((gb, 8, CHW), lambda i: (i, 0, 0))],
            out_specs=pl.BlockSpec((gb, 8, CHW), lambda i: (i, 0, 0)),
        ),
        compiler_params=pltpu.CompilerParams(
            dimension_semantics=("parallel",),
            vmem_limit_bytes=vmem_limit),
    )(scale_row, shift_row, x3)

    y = y3.reshape(n_pad, CHW)[:N]
    return y.reshape(T, B, C, H, W)


# ---------------------------- reference & test --------------------------------


def _reference(x_seq, gamma, beta, eps=_EPS):
    """Pure-JAX reference: BatchNorm2d (train mode) over the flattened (T*B) batch."""
    T, B, C, H, W = x_seq.shape
    x = x_seq.reshape(T * B, C, H, W).astype(jnp.float32)
    mean = jnp.mean(x, axis=(0, 2, 3), keepdims=True)
    var = jnp.mean((x - mean) ** 2, axis=(0, 2, 3), keepdims=True)    # biased var
    y = (x - mean) * lax.rsqrt(var + eps)
    y = y * gamma[None, :, None, None] + beta[None, :, None, None]
    return y.reshape(T, B, C, H, W).astype(x_seq.dtype)


if __name__ == "__main__":
    key = jax.random.PRNGKey(0)

    # --- spec shape: T=8, B=2, C=4, 16x16 spatial (exercises the fused fast path)
    T, B, C, H, W = 8, 2, 4, 16, 16
    kx, kg, kb, key = jax.random.split(key, 4)
    x_seq = jax.random.normal(kx, (T, B, C, H, W), dtype=jnp.float32)
    gamma = 1.0 + 0.1 * jax.random.normal(kg, (C,), dtype=jnp.float32)
    beta = 0.1 * jax.random.normal(kb, (C,), dtype=jnp.float32)

    y = jax.block_until_ready(td_batchnorm(x_seq, gamma, beta))
    assert y.shape == (T, B, C, H, W), y.shape
    y_ref = jax.block_until_ready(_reference(x_seq, gamma, beta))
    err = float(jnp.max(jnp.abs(y - y_ref)))
    assert jnp.allclose(y, y_ref, rtol=1e-3, atol=1e-3), f"fast path max err {err}"

    # --- general two-pass path: small forced block budget -> multi-block grid
    #     and the 2-way (per-TensorCore) stats split
    T2, B2, C2, H2, W2 = 8, 4, 8, 16, 16
    kx2, kg2, kb2, key = jax.random.split(key, 4)
    x_b = jax.random.normal(kx2, (T2, B2, C2, H2, W2), dtype=jnp.float32)
    g_b = 1.0 + 0.1 * jax.random.normal(kg2, (C2,), dtype=jnp.float32)
    b_b = 0.1 * jax.random.normal(kb2, (C2,), dtype=jnp.float32)
    y_b = jax.block_until_ready(
        td_batchnorm(x_b, g_b, b_b, block_budget_bytes=64 * 1024, use_fast_path=False))
    y_b_ref = jax.block_until_ready(_reference(x_b, g_b, b_b))
    err2 = float(jnp.max(jnp.abs(y_b - y_b_ref)))
    assert jnp.allclose(y_b, y_b_ref, rtol=1e-3, atol=1e-3), f"general path max err {err2}"

    # --- N not a multiple of 8 (exercises zero-padding + output slicing)
    T3, B3, C3, H3, W3 = 3, 2, 4, 8, 8
    kx3, kg3, kb3, key = jax.random.split(key, 4)
    x_c = jax.random.normal(kx3, (T3, B3, C3, H3, W3), dtype=jnp.float32)
    g_c = 1.0 + 0.1 * jax.random.normal(kg3, (C3,), dtype=jnp.float32)
    b_c = 0.1 * jax.random.normal(kb3, (C3,), dtype=jnp.float32)
    y_c = jax.block_until_ready(td_batchnorm(x_c, g_c, b_c, use_fast_path=False))
    y_c_ref = jax.block_until_ready(_reference(x_c, g_c, b_c))
    err3 = float(jnp.max(jnp.abs(y_c - y_c_ref)))
    assert jnp.allclose(y_c, y_c_ref, rtol=1e-3, atol=1e-3), f"padded path max err {err3}"

    print("KERNEL_OK")
</pallas_src>

<mosaic_0001>
module attributes {stable_mosaic.version = 11 : i64} {
  func.func @_bn_fused_kernel(%arg0: memref<16x4x256xf32, #tpu.memory_space<vmem>>, %arg1: memref<1x4x1xf32, #tpu.memory_space<vmem>>, %arg2: memref<1x4x1xf32, #tpu.memory_space<vmem>>, %arg3: memref<16x4x256xf32, #tpu.memory_space<vmem>>) attributes {dimension_semantics = [], scalar_prefetch = 0 : i64, scratch_operands = 0 : i64, tpu.core_type = #tpu.core_type<tc>} {
    %c0 = arith.constant 0 : index
    %c0_0 = arith.constant 0 : index
    %c0_1 = arith.constant 0 : index
    %0 = vector.load %arg0[%c0, %c0_0, %c0_1] : memref<16x4x256xf32, #tpu.memory_space<vmem>>, vector<16x4x256xf32>
    %cst = arith.constant dense<0.000000e+00> : vector<4xf32>
    %1 = vector.multi_reduction <add>, %0, %cst [0, 2] : vector<16x4x256xf32> to vector<4xf32>
    %2 = vector.shape_cast %1 : vector<4xf32> to vector<1x4x1xf32>
    %3 = arith.mulf %0, %0 : vector<16x4x256xf32>
    %cst_2 = arith.constant dense<0.000000e+00> : vector<4xf32>
    %4 = vector.multi_reduction <add>, %3, %cst_2 [0, 2] : vector<16x4x256xf32> to vector<4xf32>
    %5 = vector.shape_cast %4 : vector<4xf32> to vector<1x4x1xf32>
    %cst_3 = arith.constant 2.44140625E-4 : f32
    %6 = vector.broadcast %cst_3 : f32 to vector<1x4x1xf32>
    %7 = arith.mulf %2, %6 : vector<1x4x1xf32>
    %cst_4 = arith.constant 2.44140625E-4 : f32
    %8 = vector.broadcast %cst_4 : f32 to vector<1x4x1xf32>
    %9 = arith.mulf %5, %8 : vector<1x4x1xf32>
    %10 = arith.mulf %7, %7 : vector<1x4x1xf32>
    %11 = arith.subf %9, %10 : vector<1x4x1xf32>
    %cst_5 = arith.constant 0.000000e+00 : f32
    %12 = vector.broadcast %cst_5 : f32 to vector<1x4x1xf32>
    %13 = arith.maximumf %11, %12 : vector<1x4x1xf32>
    %c0_6 = arith.constant 0 : index
    %c0_7 = arith.constant 0 : index
    %c0_8 = arith.constant 0 : index
    %14 = vector.load %arg1[%c0_6, %c0_7, %c0_8] : memref<1x4x1xf32, #tpu.memory_space<vmem>>, vector<1x4x1xf32>
    %cst_9 = arith.constant 9.99999974E-6 : f32
    %15 = vector.broadcast %cst_9 : f32 to vector<1x4x1xf32>
    %16 = arith.addf %13, %15 : vector<1x4x1xf32>
    %17 = math.rsqrt %16 : vector<1x4x1xf32>
    %18 = arith.mulf %14, %17 : vector<1x4x1xf32>
    %c0_10 = arith.constant 0 : index
    %c0_11 = arith.constant 0 : index
    %c0_12 = arith.constant 0 : index
    %19 = vector.load %arg2[%c0_10, %c0_11, %c0_12] : memref<1x4x1xf32, #tpu.memory_space<vmem>>, vector<1x4x1xf32>
    %20 = arith.mulf %7, %18 : vector<1x4x1xf32>
    %21 = arith.subf %19, %20 : vector<1x4x1xf32>
    %22 = vector.broadcast %18 : vector<1x4x1xf32> to vector<16x4x256xf32>
    %23 = arith.mulf %0, %22 : vector<16x4x256xf32>
    %24 = vector.broadcast %21 : vector<1x4x1xf32> to vector<16x4x256xf32>
    %25 = arith.addf %23, %24 : vector<16x4x256xf32>
    %c0_13 = arith.constant 0 : index
    %c0_14 = arith.constant 0 : index
    %c0_15 = arith.constant 0 : index
    %26 = vector.load %arg3[%c0_13, %c0_14, %c0_15] : memref<16x4x256xf32, #tpu.memory_space<vmem>>, vector<16x4x256xf32>
    tpu.vector_store %arg3[%c0_13, %c0_14, %c0_15], %25 {strides = array<i32>} : memref<16x4x256xf32, #tpu.memory_space<vmem>>, vector<16x4x256xf32>,
    return
  }
}

</mosaic_0001>

<bundles_post_ra>
// kernel: td_batchnorm.1
= control target key start
LH: loop header
LB: loop body
LE: loop exit
PB: predicated region body
PF: predicated region fallthrough
CT: control target
= control target key end

     0   :  { %vm78_vm0 = vcmask 1043456   ;;  %s699_s0 = inlined_call_operand.vmem [shape: f32[16,4,256], index: 0, kind: input, shape index: {}]   ;;  %s700_s1 = inlined_call_operand.vmem [shape: f32[1,4,1], index: 1, kind: input, shape index: {}]   ;;  %s701_s2 = inlined_call_operand.vmem [shape: f32[1,4,1], index: 2, kind: input, shape index: {}]   ;;  %s702_s3 = inlined_call_operand.vmem [shape: f32[16,4,256], index: 3, kind: output, shape index: {}]  }
   0x1   :  { %v408_v0 = vld [vmem:[%s699_s0] sm:$0xff]  ;;  %v413_v1 = vld [vmem:[%s699_s0 + $0x8] sm:$0xff]  ;;  %v424_v5 = vld [vmem:[%s699_s0 + $0x10] sm:$0xff] }
   0x2   :  { %v46_v2 = vcombine.high %v408_v0, %v408_v0  ;;  %v47_v3 = vcombine.high %v413_v1, %v413_v1  ;;  %v79_v4 = vsel %vm78_vm0, %v408_v0, 0.0  ;;  %v82_v7 = vsel %vm78_vm0, %v413_v1, 0.0  ;;  %v435_v11 = vld [vmem:[%s699_s0 + $0x18] sm:$0xff]  ;;  %v445_v17 = vld [vmem:[%s699_s0 + $0x20] sm:$0xff]  ;;  %v455_v23 = vld [vmem:[%s699_s0 + $0x28] sm:$0xff] }
   0x3   :  { %v48_v9 = vcombine.high %v424_v5, %v424_v5  ;;  %v86_v13 = vsel %vm78_vm0, %v424_v5, 0.0  ;;  %v49_v15 = vcombine.high %v435_v11, %v435_v11  ;;  %v90_v19 = vsel %vm78_vm0, %v435_v11, 0.0  ;;  %v469_v31 = vld [vmem:[%s699_s0 + $0x30] sm:$0xff]  ;;  %v476_v36 = vld [vmem:[%s699_s0 + $0x38] sm:$0xff]  ;;  %v493_v49 = vld [vmem:[%s699_s0 + $0x40] sm:$0xff] }
   0x4   :  { %v80_v6 = vsel %vm78_vm0, %v46_v2, 0.0  ;;  %v84_v10 = vsel %vm78_vm0, %v47_v3, 0.0  ;;  %v50_v21 = vcombine.high %v445_v17, %v445_v17  ;;  %v94_v25 = vsel %vm78_vm0, %v445_v17, 0.0  ;;  %v507_v61 = vld [vmem:[%s699_s0 + $0x48] sm:$0xff] }
   0x5   :  { %v81_v8 = vadd.f32 %v80_v6, %v79_v4  ;;  %v88_v16 = vsel %vm78_vm0, %v48_v9, 0.0  ;;  %v92_v22 = vsel %vm78_vm0, %v49_v15, 0.0  ;;  %v144_v26 = vmul.f32 %v408_v0, %v408_v0 }
   0x6   :  { %v51_v28 = vcombine.high %v455_v23, %v455_v23  ;;  %v96_v29 = vsel %vm78_vm0, %v50_v21, 0.0  ;;  %v145_v30 = vmul.f32 %v413_v1, %v413_v1  ;;  %v98_v33 = vsel %vm78_vm0, %v455_v23, 0.0 }
   0x7   :  { %v83_v12 = vadd.f32 %v82_v7, %v81_v8  ;;  %v176_v34 = vcombine.high %v144_v26, %v144_v26  ;;  %v52_v37 = vcombine.high %v469_v31, %v469_v31  ;;  %v146_v39 = vmul.f32 %v424_v5, %v424_v5 }
   0x8   :  { %v100_v38 = vsel %vm78_vm0, %v51_v28, 0.0  ;;  %v177_v40 = vcombine.high %v145_v30, %v145_v30  ;;  %v102_v42 = vsel %vm78_vm0, %v469_v31, 0.0  ;;  %v208_v43 = vsel %vm78_vm0, %v144_v26, 0.0 }
   0x9   :  { %v85_v14 = vadd.f32 %v84_v10, %v83_v12  ;;  %v209_v44 = vsel %vm78_vm0, %v176_v34, 0.0  ;;  %v53_v45 = vcombine.high %v476_v36, %v476_v36  ;;  %v211_v48 = vsel %vm78_vm0, %v145_v30, 0.0 }
   0xa   :  { %v210_v47 = vadd.f32 %v209_v44, %v208_v43  ;;  %v104_v50 = vsel %vm78_vm0, %v52_v37, 0.0  ;;  %v147_v51 = vmul.f32 %v435_v11, %v435_v11  ;;  %v178_v52 = vcombine.high %v146_v39, %v146_v39 }
   0xb   :  { %v87_v18 = vadd.f32 %v86_v13, %v85_v14  ;;  %v213_v53 = vsel %vm78_vm0, %v177_v40, 0.0  ;;  %v106_v56 = vsel %vm78_vm0, %v476_v36, 0.0  ;;  %v215_v57 = vsel %vm78_vm0, %v146_v39, 0.0  ;;  %v521_v13 = vld [vmem:[%s699_s0 + $0x50] sm:$0xff] }
   0xc   :  { %v212_v55 = vadd.f32 %v211_v48, %v210_v47  ;;  %v54_v58 = vcombine.high %v493_v49, %v493_v49  ;;  %v108_v62 = vsel %vm78_vm0, %v53_v45, 0.0  ;;  %v148_v63 = vmul.f32 %v445_v17, %v445_v17 }
   0xd   :  { %v89_v20 = vadd.f32 %v88_v16, %v87_v18  ;;  %v179_v2 = vcombine.high %v147_v51, %v147_v51  ;;  %v217_v3 = vsel %vm78_vm0, %v178_v52, 0.0  ;;  %v110_v7 = vsel %vm78_vm0, %v493_v49, 0.0 }
   0xe   :  { %v214_v60 = vadd.f32 %v213_v53, %v212_v55  ;;  %v219_v8 = vsel %vm78_vm0, %v147_v51, 0.0  ;;  %v55_v9 = vcombine.high %v507_v61, %v507_v61  ;;  %v112_v14 = vsel %vm78_vm0, %v54_v58, 0.0 }
   0xf   :  { %v91_v24 = vadd.f32 %v90_v19, %v89_v20  ;;  %v149_v15 = vmul.f32 %v455_v23, %v455_v23  ;;  %v180_v16 = vcombine.high %v148_v63, %v148_v63  ;;  %v221_v18 = vsel %vm78_vm0, %v179_v2, 0.0 }
  0x10   :  { %v216_v6 = vadd.f32 %v215_v57, %v214_v60  ;;  %v114_v21 = vsel %vm78_vm0, %v507_v61, 0.0  ;;  %v116_v28 = vsel %vm78_vm0, %v55_v9, 0.0  ;;  %v151_v43 = vmul.f32 %v476_v36, %v476_v36 }
  0x11   :  { %v93_v27 = vadd.f32 %v92_v22, %v91_v24  ;;  %v223_v22 = vsel %vm78_vm0, %v148_v63, 0.0  ;;  %v56_v24 = vcombine.high %v521_v13, %v521_v13  ;;  %v181_v30 = vcombine.high %v149_v15, %v149_v15 }
  0x12   :  { %v218_v12 = vadd.f32 %v217_v3, %v216_v6  ;;  %v227_v37 = vsel %vm78_vm0, %v149_v15, 0.0  ;;  %v183_v57 = vcombine.high %v151_v43, %v151_v43  ;;  %v235_v63 = vsel %vm78_vm0, %v151_v43, 0.0  ;;  %v577_v6 = vld [vmem:[%s699_s0 + $0x70] sm:$0xff] }
  0x13   :  { %v95_v32 = vadd.f32 %v94_v25, %v93_v27  ;;  %v535_v27 = vld [vmem:[%s699_s0 + $0x58] sm:$0xff]  ;;  %v229_v45 = vsel %vm78_vm0, %v181_v30, 0.0  ;;  %v134_v30 = vsel %vm78_vm0, %v577_v6, 0.0 }
  0x14   :  { %v220_v20 = vadd.f32 %v219_v8, %v218_v12  ;;  %v122_v48 = vsel %vm78_vm0, %v535_v27, 0.0  ;;  %v153_v8 = vmul.f32 %v507_v61, %v507_v61 }
  0x15   :  { %v97_v35 = vadd.f32 %v96_v29, %v95_v32  ;;  %v150_v29 = vmul.f32 %v469_v31, %v469_v31  ;;  %v225_v32 = vsel %vm78_vm0, %v180_v16, 0.0 }
  0x16   :  { %v222_v26 = vadd.f32 %v221_v18, %v220_v20  ;;  %v60_v18 = vcombine.high %v577_v6, %v577_v6 }
  0x17   :  { %v99_v41 = vadd.f32 %v98_v33, %v97_v35  ;;  %v118_v35 = vsel %vm78_vm0, %v521_v13, 0.0  ;;  %v182_v44 = vcombine.high %v150_v29, %v150_v29 }
  0x18   :  { %v224_v34 = vadd.f32 %v223_v22, %v222_v26 }
  0x19   :  { %v101_v46 = vadd.f32 %v100_v38, %v99_v41  ;;  %v57_v38 = vcombine.high %v535_v27, %v535_v27  ;;  %v549_v41 = vld [vmem:[%s699_s0 + $0x60] sm:$0xff]  ;;  %v233_v58 = vsel %vm78_vm0, %v182_v44, 0.0 }
  0x1a   :  { %v226_v40 = vadd.f32 %v225_v32, %v224_v34  ;;  %v58_v51 = vcombine.high %v549_v41, %v549_v41  ;;  %v243_v32 = vsel %vm78_vm0, %v153_v8, 0.0 }
  0x1b   :  { %v103_v54 = vadd.f32 %v102_v42, %v101_v46  ;;  %v120_v42 = vsel %vm78_vm0, %v56_v24, 0.0  ;;  %v124_v55 = vsel %vm78_vm0, %v57_v38, 0.0  ;;  %v154_v24 = vmul.f32 %v521_v13, %v521_v13 }
  0x1c   :  { %v228_v47 = vadd.f32 %v227_v37, %v226_v40  ;;  %v136_v37 = vsel %vm78_vm0, %v60_v18, 0.0  ;;  %v155_v38 = vmul.f32 %v535_v27, %v535_v27 }
  0x1d   :  { %v105_v59 = vadd.f32 %v104_v50, %v103_v54  ;;  %v231_v50 = vsel %vm78_vm0, %v150_v29, 0.0  ;;  %v563_v54 = vld [vmem:[%s699_s0 + $0x68] sm:$0xff] }
  0x1e   :  { %v230_v53 = vadd.f32 %v229_v45, %v228_v47  ;;  %v59_v2 = vcombine.high %v563_v54, %v563_v54  ;;  %v130_v15 = vsel %vm78_vm0, %v563_v54, 0.0  ;;  %v247_v45 = vsel %vm78_vm0, %v154_v24, 0.0 }
  0x1f   :  { %v107_v4 = vadd.f32 %v106_v56, %v105_v59  ;;  %v152_v56 = vmul.f32 %v493_v49, %v493_v49 }
  0x20   :  { %v232_v60 = vadd.f32 %v231_v50, %v230_v53  ;;  %v132_v22 = vsel %vm78_vm0, %v59_v2, 0.0  ;;  %v156_v50 = vmul.f32 %v549_v41, %v549_v41 }
  0x21   :  { %v109_v10 = vadd.f32 %v108_v62, %v107_v4  ;;  %v126_v62 = vsel %vm78_vm0, %v549_v41, 0.0  ;;  %v184_v9 = vcombine.high %v152_v56, %v152_v56  ;;  %v239_v16 = vsel %vm78_vm0, %v152_v56, 0.0 }
  0x22   :  { %v234_v4 = vadd.f32 %v233_v58, %v232_v60  ;;  %v251_v56 = vsel %vm78_vm0, %v155_v38, 0.0  ;;  %v188_v60 = vcombine.high %v156_v50, %v156_v50  ;;  %v255_v2 = vsel %vm78_vm0, %v156_v50, 0.0 }
  0x23   :  { %v111_v19 = vadd.f32 %v110_v7, %v109_v10  ;;  %v128_v7 = vsel %vm78_vm0, %v58_v51, 0.0  ;;  %v237_v10 = vsel %vm78_vm0, %v183_v57, 0.0  ;;  %v241_v26 = vsel %vm78_vm0, %v184_v9, 0.0 }
  0x24   :  { %v187_v51 = vcombine.high %v155_v38, %v155_v38 }
  0x25   :  { %v113_v25 = vadd.f32 %v112_v14, %v111_v19  ;;  %v236_v14 = vadd.f32 %v235_v63, %v234_v4  ;;  %v158_v4 = vmul.f32 %v577_v6, %v577_v6 }
  0x27   :  { %v115_v33 = vadd.f32 %v114_v21, %v113_v25  ;;  %v238_v20 = vadd.f32 %v237_v10, %v236_v14  ;;  %v591_v21 = vld [vmem:[%s699_s0 + $0x78] sm:$0xff]  ;;  %v185_v25 = vcombine.high %v153_v8, %v153_v8  ;;  %v257_v8 = vsel %vm78_vm0, %v188_v60, 0.0 }
  0x28   :  { %v138_v44 = vsel %vm78_vm0, %v591_v21, 0.0  ;;  %v159_v14 = vmul.f32 %v591_v21, %v591_v21 }
  0x29   :  { %v117_v39 = vadd.f32 %v116_v28, %v115_v33  ;;  %v240_v29 = vadd.f32 %v239_v16, %v238_v20  ;;  %v61_v33 = vcombine.high %v591_v21, %v591_v21  ;;  %v245_v40 = vsel %vm78_vm0, %v185_v25, 0.0 }
  0x2b   :  { %v119_v46 = vadd.f32 %v118_v35, %v117_v39  ;;  %v242_v35 = vadd.f32 %v241_v26, %v240_v29  ;;  %v186_v39 = vcombine.high %v154_v24, %v154_v24  ;;  %v267_v26 = vsel %vm78_vm0, %v159_v14, 0.0 }
  0x2d   :  { %v121_v52 = vadd.f32 %v120_v42, %v119_v46  ;;  %v244_v43 = vadd.f32 %v243_v32, %v242_v35 }
  0x2f   :  { %v123_v59 = vadd.f32 %v122_v48, %v121_v52  ;;  %v246_v47 = vadd.f32 %v245_v40, %v244_v43  ;;  %v140_v48 = vsel %vm78_vm0, %v61_v33, 0.0  ;;  %v249_v52 = vsel %vm78_vm0, %v186_v39, 0.0 }
  0x30   :  { %v383_v33 = vmov 0  }
  0x31   :  { %v125_v3 = vadd.f32 %v124_v55, %v123_v59  ;;  %v248_v55 = vadd.f32 %v247_v45, %v246_v47  ;;  %v157_v59 = vmul.f32 %v563_v54, %v563_v54  ;;  %363 = vset.pattern.permute.xlu1 %v383_v33  ;;  %364 = vset.pattern.permute.xlu0 %v383_v33  ;;  %v282_v47 = vld [vmem:[%s701_s2] sm:$0xf] }
  0x33   :  { %v127_v12 = vadd.f32 %v126_v62, %v125_v3  ;;  %v250_v58 = vadd.f32 %v249_v52, %v248_v55  ;;  %v253_v62 = vsel %vm78_vm0, %v187_v51, 0.0  ;;  %v259_v10 = vsel %vm78_vm0, %v157_v59, 0.0 }
  0x34   :  { %v384_v51 = vmov 839922192  }
  0x35   :  { %v129_v19 = vadd.f32 %v128_v7, %v127_v12  ;;  %v252_v63 = vadd.f32 %v251_v56, %v250_v58  ;;  %v189_v7 = vcombine.high %v157_v59, %v157_v59  ;;  %v290_v52 = vunpack.c.l.s4 %v384_v51 }
  0x37   :  { %v131_v28 = vadd.f32 %v130_v15, %v129_v19  ;;  %v254_v3 = vadd.f32 %v253_v62, %v252_v63  ;;  %v190_v15 = vcombine.high %v158_v4, %v158_v4  ;;  %v261_v16 = vsel %vm78_vm0, %v189_v7, 0.0 }
  0x38   :  { %v263_v19 = vsel %vm78_vm0, %v158_v4, 0.0  ;;  %v291_v55 = vunpack.c.0.s8 %v290_v52 }
  0x39   :  { %v133_v34 = vadd.f32 %v132_v22, %v131_v28  ;;  %v256_v9 = vadd.f32 %v255_v2, %v254_v3  ;;  %v191_v22 = vcombine.high %v159_v14, %v159_v14  ;;  %v265_v24 = vsel %vm78_vm0, %v190_v15, 0.0 }
  0x3b   :  { %v135_v42 = vadd.f32 %v134_v30, %v133_v34  ;;  %v258_v12 = vadd.f32 %v257_v8, %v256_v9  ;;  %v269_v29 = vsel %vm78_vm0, %v191_v22, 0.0 }
  0x3d   :  { %v137_v46 = vadd.f32 %v136_v37, %v135_v42  ;;  %v260_v18 = vadd.f32 %v259_v10, %v258_v12 }
  0x3f   :  { %v139_v53 = vadd.f32 %v138_v44, %v137_v46  ;;  %v262_v20 = vadd.f32 %v261_v16, %v260_v18  ;;  %v278_v44 = vld [vmem:[%s700_s1] sm:$0xf] }
  0x41   :  { %v141_v57 = vadd.f32 %v140_v48, %v139_v53  ;;  %v264_v25 = vadd.f32 %v263_v19, %v262_v20  ;;  %v292_v53 = vlaneseq }
  0x43   :  { %142 = vadd.xlane.f32.xlu0 %v141_v57  ;;  %v266_v28 = vadd.f32 %v265_v24, %v264_v25  ;;  %v293_v56 = vshrl.u32 %v292_v53, 7 }
  0x45   :  { %v268_v30 = vadd.f32 %v267_v26, %v266_v28  ;;  %v294_v57 = vsub.s32 %v291_v55, %v293_v56 }
  0x47   :  { %v270_v32 = vadd.f32 %v269_v29, %v268_v30 }
  0x49   :  { %271 = vadd.xlane.f32.xlu0 %v270_v32 }
  0xd0   :  { %v143_v34 = vpop.xlane.xlu0 %142 }
  0xd1   :  { %v273_v35 = vmul.f32 0.00024414063, %v143_v34 }
  0xd3   :  { %v275_v38 = vmul.f32 %v273_v35, %v273_v35 }
  0xd6   :  { %v272_v37 = vpop.xlane.xlu0 %271 }
  0xd7   :  { %v274_v39 = vmul.f32 0.00024414063, %v272_v37 }
  0xd9   :  { %v276_v40 = vsub.f32 %v274_v39, %v275_v38 }
  0xdb   :  { %v277_v42 = vmax.f32 %v276_v40, 0.0 }
  0xdd   :  { %v279_v43 = vadd.f32 1e-05, %v277_v42 }
  0xdf   :  { %381 = vrsqrt.f32 %v279_v43 }
  0xe9   :  { %v382_v45 = vpop.eup %381 }
  0xea   :  { %v281_v46 = vmul.f32 %v382_v45, %v278_v44 }
  0xec   :  { %287 = vperm.xlu1 %363, %v281_v46   ;;  %v283_v48 = vmul.f32 %v281_v46, %v273_v35 }
  0xee   :  { %v284_v50 = vsub.f32 %v282_v47, %v283_v48 }
  0xf0   :  { %315 = vperm.xlu1 %363, %v284_v50  }
 0x16b   :  { %v288_v58 = vpop.permute.xlu1 %287 }
 0x16c   :  { %v295_v59 = vrot.slane %v288_v58, %v294_v57 }
 0x16e   :  { %v297_v60 = vmul.f32 %v295_v59, %v408_v0  ;;  %v298_v63 = vmul.f32 %v295_v59, %v413_v1  ;;  %v299_v2 = vmul.f32 %v295_v59, %v424_v5  ;;  %v300_v3 = vmul.f32 %v295_v59, %v435_v11 }
 0x16f   :  { %v316_v62 = vpop.permute.xlu1 %315  ;;  %v301_v4 = vmul.f32 %v295_v59, %v445_v17  ;;  %v302_v7 = vmul.f32 %v295_v59, %v455_v23  ;;  %v303_v8 = vmul.f32 %v295_v59, %v469_v31  ;;  %v304_v9 = vmul.f32 %v295_v59, %v476_v36 }
 0x170   :  { %v305_v10 = vmul.f32 %v295_v59, %v493_v49  ;;  %v306_v12 = vmul.f32 %v295_v59, %v507_v61  ;;  %v307_v0 = vmul.f32 %v295_v59, %v521_v13  ;;  %v308_v1 = vmul.f32 %v295_v59, %v535_v27 }
 0x171   :  { %v323_v14 = vrot.slane %v316_v62, %v294_v57  ;;  %v309_v5 = vmul.f32 %v295_v59, %v549_v41  ;;  %v310_v11 = vmul.f32 %v295_v59, %v563_v54  ;;  %v311_v17 = vmul.f32 %v295_v59, %v577_v6 }
 0x172   :  { %v312_v23 = vmul.f32 %v295_v59, %v591_v21 }
 0x173   :  { %v325_v31 = vadd.f32 %v323_v14, %v297_v60  ;;  %v326_v15 = vadd.f32 %v323_v14, %v298_v63  ;;  %v327_v36 = vadd.f32 %v323_v14, %v299_v2  ;;  %v328_v16 = vadd.f32 %v323_v14, %v300_v3 }
 0x174   :  { %v329_v49 = vadd.f32 %v323_v14, %v301_v4  ;;  %v330_v18 = vadd.f32 %v323_v14, %v302_v7  ;;  %v331_v61 = vadd.f32 %v323_v14, %v303_v8  ;;  %v332_v19 = vadd.f32 %v323_v14, %v304_v9 }
 0x175   :  { %v333_v13 = vadd.f32 %v323_v14, %v305_v10  ;;  %v334_v20 = vadd.f32 %v323_v14, %v306_v12  ;;  %v335_v27 = vadd.f32 %v323_v14, %v307_v0  ;;  %v336_v22 = vadd.f32 %v323_v14, %v308_v1  ;;  %341 = vst [vmem:[%s702_s3] sm:$0xff] %v325_v31 }
 0x176   :  { %342 = vst [vmem:[%s702_s3 + $0x8] sm:$0xff] %v326_v15  ;;  %343 = vst [vmem:[%s702_s3 + $0x10] sm:$0xff] %v327_v36  ;;  %v337_v41 = vadd.f32 %v323_v14, %v309_v5  ;;  %v338_v54 = vadd.f32 %v323_v14, %v310_v11  ;;  %v339_v6 = vadd.f32 %v323_v14, %v311_v17 }
 0x177   :  { %344 = vst [vmem:[%s702_s3 + $0x18] sm:$0xff] %v328_v16  ;;  %v340_v21 = vadd.f32 %v323_v14, %v312_v23  ;;  %345 = vst [vmem:[%s702_s3 + $0x20] sm:$0xff] %v329_v49 }
 0x178   :  { %346 = vst [vmem:[%s702_s3 + $0x28] sm:$0xff] %v330_v18  ;;  %347 = vst [vmem:[%s702_s3 + $0x30] sm:$0xff] %v331_v61 }
 0x179   :  { %348 = vst [vmem:[%s702_s3 + $0x38] sm:$0xff] %v332_v19  ;;  %349 = vst [vmem:[%s702_s3 + $0x40] sm:$0xff] %v333_v13 }
 0x17a   :  { %350 = vst [vmem:[%s702_s3 + $0x48] sm:$0xff] %v334_v20  ;;  %351 = vst [vmem:[%s702_s3 + $0x50] sm:$0xff] %v335_v27 }
 0x17b   :  { %352 = vst [vmem:[%s702_s3 + $0x58] sm:$0xff] %v336_v22  ;;  %353 = vst [vmem:[%s702_s3 + $0x60] sm:$0xff] %v337_v41 }
 0x17c   :  { %354 = vst [vmem:[%s702_s3 + $0x68] sm:$0xff] %v338_v54  ;;  %355 = vst [vmem:[%s702_s3 + $0x70] sm:$0xff] %v339_v6 }
 0x17d   :  { %356 = vst [vmem:[%s702_s3 + $0x78] sm:$0xff] %v340_v21 }

</bundles_post_ra>
